<compile_context>
chip_gen: v5e
topology: v5e:2x2
jax: 0.10.0
libtpu: 0.0.40
codegen_flags: <defaults>
</compile_context>

<pallas_src>
import functools

import jax
import jax.numpy as jnp
from jax.experimental import pallas as pl
from jax.experimental.pallas import tpu as pltpu


def _mlp_kernel(*refs, num_layers):
    # refs layout: x_ref, (w_ref, b_ref) * num_layers, out_ref
    x_ref = refs[0]
    out_ref = refs[-1]
    wb_refs = refs[1:-1]

    h = x_ref[...]  # native dtype (f32 or bf16) -> MXU directly
    for i in range(num_layers):
        w = wb_refs[2 * i][...]        # [K, N], native dtype (pre-transposed)
        b = wb_refs[2 * i + 1][...]    # [1, N], f32
        y = jnp.dot(h, w, preferred_element_type=jnp.float32) + b
        last = i == num_layers - 1
        h = y.astype(out_ref.dtype if last else x_ref.dtype)
    out_ref[...] = h


def _round_up(v, m):
    return ((v + m - 1) // m) * m


def simplified_mlp_forward(x, weights, biases, *, lane=128, max_batch_tile=256):
    """x: [batch, input_dim]; weights[i]: [out_f, in_f] (torch layout); biases[i]: [out_f]."""
    num_layers = len(weights)
    batch, in_dim = x.shape
    out_dim = weights[-1].shape[0]
    dtype = x.dtype

    # ---- pad to TPU-friendly shapes (trace-time, zero padding keeps math exact) ----
    sublane = 8
    batch_tile = max_batch_tile if batch >= max_batch_tile else _round_up(batch, sublane)
    batch_pad = _round_up(batch, batch_tile)

    dims = [in_dim] + [w.shape[0] for w in weights]
    dims_pad = [_round_up(d, lane) for d in dims]

    x_p = jnp.zeros((batch_pad, dims_pad[0]), dtype).at[:batch, :in_dim].set(x)

    flat_params = []
    in_specs = [pl.BlockSpec((batch_tile, dims_pad[0]), lambda i: (i, 0))]
    for li, (w, b) in enumerate(zip(weights, biases)):
        out_f, in_f = w.shape
        in_p, out_p = dims_pad[li], dims_pad[li + 1]
        # Pre-transpose to [K, N] and zero-pad; bias kept in f32 (accumulator dtype).
        w_t = jnp.zeros((in_p, out_p), w.dtype).at[:in_f, :out_f].set(w.T)
        b_p = jnp.zeros((1, out_p), jnp.float32).at[0, :out_f].set(b.astype(jnp.float32))
        flat_params += [w_t, b_p]
        # Constant index maps -> weights/biases stay VMEM-resident across grid steps.
        in_specs += [
            pl.BlockSpec((in_p, out_p), lambda i: (0, 0)),
            pl.BlockSpec((1, out_p), lambda i: (0, 0)),
        ]

    kernel = functools.partial(_mlp_kernel, num_layers=num_layers)

    out_pad = pl.pallas_call(
        kernel,
        out_shape=jax.ShapeDtypeStruct((batch_pad, dims_pad[-1]), dtype),
        grid=(batch_pad // batch_tile,),
        in_specs=in_specs,
        out_specs=pl.BlockSpec((batch_tile, dims_pad[-1]), lambda i: (i, 0)),
        compiler_params=pltpu.CompilerParams(
            dimension_semantics=("parallel",)),
    )(x_p, *flat_params)

    return out_pad[:batch, :out_dim]


def init_params(key, input_dim, hidden_dim, num_mlp_layers, dtype=jnp.float32):
    """PyTorch-style default init: U(-1/sqrt(fan_in), 1/sqrt(fan_in))."""
    weights, biases = [], []
    dims = [(input_dim, hidden_dim)] + [(hidden_dim, hidden_dim)] * (num_mlp_layers - 1)
    for (in_f, out_f) in dims:
        key, kw, kb = jax.random.split(key, 3)
        bound = 1.0 / (in_f ** 0.5)
        w = jax.random.uniform(kw, (out_f, in_f), dtype=dtype, minval=-bound, maxval=bound)
        b = jax.random.uniform(kb, (out_f,), dtype=dtype, minval=-bound, maxval=bound)
        weights.append(w)
        biases.append(b)
    return weights, biases


def reference_mlp(x, weights, biases):
    h = x
    for w, b in zip(weights, biases):
        h = h @ w.T + b
    return h


if __name__ == "__main__":
    input_dim = 16
    hidden_dim = 32
    num_mlp_layers = 3
    batch = 2

    key = jax.random.PRNGKey(0)
    key, kx = jax.random.split(key)
    x = jax.random.normal(kx, (batch, input_dim), dtype=jnp.float32)

    weights, biases = init_params(key, input_dim, hidden_dim, num_mlp_layers)

    out = simplified_mlp_forward(x, weights, biases)
    out = jax.block_until_ready(out)

    ref = reference_mlp(x, weights, biases)
    assert out.shape == (batch, hidden_dim)
    assert jnp.allclose(out, ref, atol=1e-5, rtol=1e-5), "mismatch vs reference"

    print("KERNEL_OK")
</pallas_src>

<mosaic_0001>
module attributes {stable_mosaic.version = 11 : i64} {
  func.func @_mlp_kernel(%arg0: i32, %arg1: memref<8x128xf32, #tpu.memory_space<vmem>>, %arg2: memref<128x128xf32, #tpu.memory_space<vmem>>, %arg3: memref<1x128xf32, #tpu.memory_space<vmem>>, %arg4: memref<128x128xf32, #tpu.memory_space<vmem>>, %arg5: memref<1x128xf32, #tpu.memory_space<vmem>>, %arg6: memref<128x128xf32, #tpu.memory_space<vmem>>, %arg7: memref<1x128xf32, #tpu.memory_space<vmem>>, %arg8: memref<8x128xf32, #tpu.memory_space<vmem>>) attributes {dimension_semantics = [#tpu.dimension_semantics<parallel>], iteration_bounds = array<i64: 1>, scalar_prefetch = 0 : i64, scratch_operands = 0 : i64, tpu.core_type = #tpu.core_type<tc>, window_params = [{transform_indices = @transform_0, window_bounds = array<i64: 8, 128>}, {pipeline_mode = #tpu.pipeline_mode<synchronous>, transform_indices = @transform_1, window_bounds = array<i64: 128, 128>}, {pipeline_mode = #tpu.pipeline_mode<synchronous>, transform_indices = @transform_2, window_bounds = array<i64: 1, 128>}, {pipeline_mode = #tpu.pipeline_mode<synchronous>, transform_indices = @transform_3, window_bounds = array<i64: 128, 128>}, {pipeline_mode = #tpu.pipeline_mode<synchronous>, transform_indices = @transform_4, window_bounds = array<i64: 1, 128>}, {pipeline_mode = #tpu.pipeline_mode<synchronous>, transform_indices = @transform_5, window_bounds = array<i64: 128, 128>}, {pipeline_mode = #tpu.pipeline_mode<synchronous>, transform_indices = @transform_6, window_bounds = array<i64: 1, 128>}, {transform_indices = @transform_7, window_bounds = array<i64: 8, 128>}]} {
    %c0 = arith.constant 0 : index
    %c0_0 = arith.constant 0 : index
    %0 = vector.load %arg1[%c0, %c0_0] : memref<8x128xf32, #tpu.memory_space<vmem>>, vector<8x128xf32>
    %c0_1 = arith.constant 0 : index
    %c0_2 = arith.constant 0 : index
    %1 = vector.load %arg2[%c0_1, %c0_2] : memref<128x128xf32, #tpu.memory_space<vmem>>, vector<128x128xf32>
    %c0_3 = arith.constant 0 : index
    %c0_4 = arith.constant 0 : index
    %2 = vector.load %arg3[%c0_3, %c0_4] : memref<1x128xf32, #tpu.memory_space<vmem>>, vector<1x128xf32>
    %cst = arith.constant dense<0.000000e+00> : vector<8x128xf32>
    %3 = tpu.matmul %0, %1, %cst {dimension_numbers = #tpu.dot_dimension_numbers<[1], [0], [0], [1], [0, 0, 1, 1], [], []>} : vector<8x128xf32>, vector<128x128xf32>, vector<8x128xf32> -> vector<8x128xf32>
    %4 = vector.broadcast %2 : vector<1x128xf32> to vector<8x128xf32>
    %5 = arith.addf %3, %4 : vector<8x128xf32>
    %c0_5 = arith.constant 0 : index
    %c0_6 = arith.constant 0 : index
    %6 = vector.load %arg4[%c0_5, %c0_6] : memref<128x128xf32, #tpu.memory_space<vmem>>, vector<128x128xf32>
    %c0_7 = arith.constant 0 : index
    %c0_8 = arith.constant 0 : index
    %7 = vector.load %arg5[%c0_7, %c0_8] : memref<1x128xf32, #tpu.memory_space<vmem>>, vector<1x128xf32>
    %cst_9 = arith.constant dense<0.000000e+00> : vector<8x128xf32>
    %8 = tpu.matmul %5, %6, %cst_9 {dimension_numbers = #tpu.dot_dimension_numbers<[1], [0], [0], [1], [0, 0, 1, 1], [], []>} : vector<8x128xf32>, vector<128x128xf32>, vector<8x128xf32> -> vector<8x128xf32>
    %9 = vector.broadcast %7 : vector<1x128xf32> to vector<8x128xf32>
    %10 = arith.addf %8, %9 : vector<8x128xf32>
    %c0_10 = arith.constant 0 : index
    %c0_11 = arith.constant 0 : index
    %11 = vector.load %arg6[%c0_10, %c0_11] : memref<128x128xf32, #tpu.memory_space<vmem>>, vector<128x128xf32>
    %c0_12 = arith.constant 0 : index
    %c0_13 = arith.constant 0 : index
    %12 = vector.load %arg7[%c0_12, %c0_13] : memref<1x128xf32, #tpu.memory_space<vmem>>, vector<1x128xf32>
    %cst_14 = arith.constant dense<0.000000e+00> : vector<8x128xf32>
    %13 = tpu.matmul %10, %11, %cst_14 {dimension_numbers = #tpu.dot_dimension_numbers<[1], [0], [0], [1], [0, 0, 1, 1], [], []>} : vector<8x128xf32>, vector<128x128xf32>, vector<8x128xf32> -> vector<8x128xf32>
    %14 = vector.broadcast %12 : vector<1x128xf32> to vector<8x128xf32>
    %15 = arith.addf %13, %14 : vector<8x128xf32>
    %c0_15 = arith.constant 0 : index
    %c0_16 = arith.constant 0 : index
    %16 = vector.load %arg8[%c0_15, %c0_16] : memref<8x128xf32, #tpu.memory_space<vmem>>, vector<8x128xf32>
    tpu.vector_store %arg8[%c0_15, %c0_16], %15 {strides = array<i32>} : memref<8x128xf32, #tpu.memory_space<vmem>>, vector<8x128xf32>,
    return
  }
  func.func @transform_0(%arg0: i32) -> (i32, i32) {
    %c0_i32 = arith.constant 0 : i32
    %c0_i32_0 = arith.constant 0 : i32
    return %arg0, %c0_i32 : i32, i32
  }
  func.func @transform_1(%arg0: i32) -> (i32, i32) {
    %c0_i32 = arith.constant 0 : i32
    %c0_i32_0 = arith.constant 0 : i32
    %c0_i32_1 = arith.constant 0 : i32
    return %c0_i32, %c0_i32_0 : i32, i32
  }
  func.func @transform_2(%arg0: i32) -> (i32, i32) {
    %c0_i32 = arith.constant 0 : i32
    %c0_i32_0 = arith.constant 0 : i32
    %c0_i32_1 = arith.constant 0 : i32
    return %c0_i32, %c0_i32_0 : i32, i32
  }
  func.func @transform_3(%arg0: i32) -> (i32, i32) {
    %c0_i32 = arith.constant 0 : i32
    %c0_i32_0 = arith.constant 0 : i32
    %c0_i32_1 = arith.constant 0 : i32
    return %c0_i32, %c0_i32_0 : i32, i32
  }
  func.func @transform_4(%arg0: i32) -> (i32, i32) {
    %c0_i32 = arith.constant 0 : i32
    %c0_i32_0 = arith.constant 0 : i32
    %c0_i32_1 = arith.constant 0 : i32
    return %c0_i32, %c0_i32_0 : i32, i32
  }
  func.func @transform_5(%arg0: i32) -> (i32, i32) {
    %c0_i32 = arith.constant 0 : i32
    %c0_i32_0 = arith.constant 0 : i32
    %c0_i32_1 = arith.constant 0 : i32
    return %c0_i32, %c0_i32_0 : i32, i32
  }
  func.func @transform_6(%arg0: i32) -> (i32, i32) {
    %c0_i32 = arith.constant 0 : i32
    %c0_i32_0 = arith.constant 0 : i32
    %c0_i32_1 = arith.constant 0 : i32
    return %c0_i32, %c0_i32_0 : i32, i32
  }
  func.func @transform_7(%arg0: i32) -> (i32, i32) {
    %c0_i32 = arith.constant 0 : i32
    %c0_i32_0 = arith.constant 0 : i32
    return %arg0, %c0_i32 : i32, i32
  }
}

</mosaic_0001>

<bundles_post_ra>
// kernel: tpu_custom_call.1
= control target key start
LH: loop header
LB: loop body
LE: loop exit
PB: predicated region body
PF: predicated region fallthrough
CT: control target
= control target key end

     0   :  { %12 = vsyncpa [#allocation3], 0  ;;  %s438_s0 = inlined_call_operand.hbm [shape: f32[8,128], index: 0, kind: input, shape index: {}]   ;;  %s439_s1 = inlined_call_operand.hbm [shape: f32[128,128], index: 1, kind: input, shape index: {}]   ;;  %s440_s2 = inlined_call_operand.vmem [shape: f32[1,128], index: 2, kind: input, shape index: {}]   ;;  %s441_s3 = inlined_call_operand.hbm [shape: f32[128,128], index: 3, kind: input, shape index: {}]   ;;  %s442_s4 = inlined_call_operand.vmem [shape: f32[1,128], index: 4, kind: input, shape index: {}]   ;;  %s443_s5 = inlined_call_operand.hbm [shape: f32[128,128], index: 5, kind: input, shape index: {}]   ;;  %s444_s6 = inlined_call_operand.vmem [shape: f32[1,128], index: 6, kind: input, shape index: {}]   ;;  %s445_s7 = inlined_call_operand.hbm [shape: f32[8,128], index: 7, kind: output, shape index: {}]  }
   0x1   :  { %13 = vsyncpa [#allocation6], 0 }
   0x2   :  { %14 = vsyncpa [#allocation9], 0  ;;  %s31_s26 = sshll.u32 %s439_s1, 4  ;;  %s32_s26 = int_to_ptr.hbm [resolvable:$true] %s31_s26 }
   0x3   :  { %15 = vsyncpa [#allocation4], 0  ;;  %s367_s27 = smov [#allocation5]   ;;  %s21_s8 = sshll.u32 %s438_s0, 4  ;;  %s22_s8 = int_to_ptr.hbm [resolvable:$true] %s21_s8 }
   0x4   :  { %s33_s28 = sshll.u32 %s367_s27, 4  ;;  %s368_s9 = smov 128   ;;  %s34_s28 = int_to_ptr.vmem [resolvable:$true] %s33_s28 }
   0x5   :  { %s369_s10 = smov 8   ;;  %s370_s11 = smov [#allocation2]  }
   0x6   :  { %39 = dma.hbm_to_vmem [thread:$0]  %s32_s26, 2048, %s34_s28, [#allocation6], %s368_s9, %s368_s9, %s369_s10  }
   0x7   :  { %s23_s12 = sshll.u32 %s370_s11, 4  ;;  %s46_s15 = sshll.u32 %s441_s3, 4  ;;  %s24_s12 = int_to_ptr.vmem [resolvable:$true] %s23_s12  ;;  %s47_s15 = int_to_ptr.hbm [resolvable:$true] %s46_s15 }
   0x8   :  { %26 = dma.hbm_to_vmem [thread:$0]  %s22_s8, 128, %s24_s12, [#allocation3]  }
   0x9   :  { %s61_s17 = sshll.u32 %s443_s5, 4  ;;  %s371_s18 = smov [#allocation7]   ;;  %s62_s17 = int_to_ptr.hbm [resolvable:$true] %s61_s17 }
   0xa   :  { %s48_s19 = sshll.u32 %s371_s18, 4  ;;  %s372_s0 = smov [#allocation8]   ;;  %s49_s19 = int_to_ptr.vmem [resolvable:$true] %s48_s19 }
   0xb   :  { %54 = dma.hbm_to_vmem [thread:$0]  %s47_s15, 2048, %s49_s19, [#allocation6], %s368_s9, %s368_s9, %s369_s10  }
   0xc   :  { %s63_s20 = sshll.u32 %s372_s0, 4  ;;  %s64_s20 = int_to_ptr.vmem [resolvable:$true] %s63_s20 }
   0xd   :  { %69 = dma.hbm_to_vmem [thread:$0]  %s62_s17, 2048, %s64_s20, [#allocation9], %s368_s9, %s368_s9, %s369_s10  }
   0xe   :  { %359 = dma.done.wait [#allocation3], 128  }
   0xf   :  { %360 = vsyncadd [#allocation3], 4294967168 }
  0x10   :  { %361 = dma.done.wait [#allocation6], 4096  }
  0x11   :  { %362 = vsyncadd [#allocation6], 4294963200 }
  0x12   :  { %363 = dma.done.wait [#allocation9], 2048  }
  0x13   :  { %364 = vsyncadd [#allocation9], 4294965248  ;;  %v104_v0 = vld [vmem:[#allocation5 + $0x78] sm:$0xff]  ;;  %v103_v1 = vld [vmem:[#allocation5 + $0x70] sm:$0xff]  ;;  %s217_s28 = sshll.u32 %s445_s7, 4  ;;  %s218_s28 = int_to_ptr.hbm [resolvable:$true] %s217_s28 }
  0x14   :  { %109 = vmatpush.msra.mxu0 %v104_v0  ;;  %v102_v2 = vld [vmem:[#allocation5 + $0x68] sm:$0xff]  ;;  %v101_v3 = vld [vmem:[#allocation5 + $0x60] sm:$0xff]  ;;  %v144_v4 = vld [vmem:[#allocation7 + $0x78] sm:$0xff] }
  0x15   :  { %v100_v5 = vld [vmem:[#allocation5 + $0x58] sm:$0xff]  ;;  %149 = vmatpush.msra.mxu1 %v144_v4  ;;  %v143_v6 = vld [vmem:[#allocation7 + $0x70] sm:$0xff]  ;;  %v142_v7 = vld [vmem:[#allocation7 + $0x68] sm:$0xff] }
  0x16   :  { %110 = vmatpush.msra.mxu0 %v103_v1  ;;  %v99_v8 = vld [vmem:[#allocation5 + $0x50] sm:$0xff]  ;;  %v141_v9 = vld [vmem:[#allocation7 + $0x60] sm:$0xff]  ;;  %v98_v10 = vld [vmem:[#allocation5 + $0x48] sm:$0xff] }
  0x17   :  { %150 = vmatpush.msra.mxu1 %v143_v6  ;;  %v140_v11 = vld [vmem:[#allocation7 + $0x58] sm:$0xff]  ;;  %v97_v12 = vld [vmem:[#allocation5 + $0x40] sm:$0xff]  ;;  %v139_v13 = vld [vmem:[#allocation7 + $0x50] sm:$0xff] }
  0x18   :  { %111 = vmatpush.msra.mxu0 %v102_v2  ;;  %v96_v14 = vld [vmem:[#allocation5 + $0x38] sm:$0xff]  ;;  %v138_v15 = vld [vmem:[#allocation7 + $0x48] sm:$0xff]  ;;  %v95_v16 = vld [vmem:[#allocation5 + $0x30] sm:$0xff] }
  0x19   :  { %151 = vmatpush.msra.mxu1 %v142_v7  ;;  %v137_v17 = vld [vmem:[#allocation7 + $0x40] sm:$0xff]  ;;  %v94_v18 = vld [vmem:[#allocation5 + $0x28] sm:$0xff]  ;;  %v136_v19 = vld [vmem:[#allocation7 + $0x38] sm:$0xff] }
  0x1a   :  { %112 = vmatpush.msra.mxu0 %v101_v3  ;;  %v93_v20 = vld [vmem:[#allocation5 + $0x20] sm:$0xff]  ;;  %v135_v21 = vld [vmem:[#allocation7 + $0x30] sm:$0xff]  ;;  %v92_v22 = vld [vmem:[#allocation5 + $0x18] sm:$0xff] }
  0x1b   :  { %152 = vmatpush.msra.mxu1 %v141_v9  ;;  %v134_v23 = vld [vmem:[#allocation7 + $0x28] sm:$0xff]  ;;  %v91_v24 = vld [vmem:[#allocation5 + $0x10] sm:$0xff]  ;;  %v133_v25 = vld [vmem:[#allocation7 + $0x20] sm:$0xff] }
  0x1c   :  { %113 = vmatpush.msra.mxu0 %v100_v5  ;;  %v90_v26 = vld [vmem:[#allocation5 + $0x8] sm:$0xff]  ;;  %v132_v27 = vld [vmem:[#allocation7 + $0x18] sm:$0xff]  ;;  %v89_v28 = vld [vmem:[#allocation5] sm:$0xff] }
  0x1d   :  { %153 = vmatpush.msra.mxu1 %v140_v11  ;;  %v88_v29 = vld [vmem:[#allocation2] sm:$0xff]  ;;  %v131_v30 = vld [vmem:[#allocation7 + $0x10] sm:$0xff]  ;;  %v130_v31 = vld [vmem:[#allocation7 + $0x8] sm:$0xff] }
  0x1e   :  { %114 = vmatpush.msra.mxu0 %v99_v8  ;;  %v129_v32 = vld [vmem:[#allocation7] sm:$0xff]  ;;  %v184_v33 = vld [vmem:[#allocation8 + $0x78] sm:$0xff]  ;;  %v183_v34 = vld [vmem:[#allocation8 + $0x70] sm:$0xff] }
  0x1f   :  { %154 = vmatpush.msra.mxu1 %v139_v13  ;;  %189 = vmatpush.msra.mxu2 %v184_v33  ;;  %v182_v35 = vld [vmem:[#allocation8 + $0x68] sm:$0xff]  ;;  %v181_v36 = vld [vmem:[#allocation8 + $0x60] sm:$0xff]  ;;  %v180_v37 = vld [vmem:[#allocation8 + $0x58] sm:$0xff] }
  0x20   :  { %115 = vmatpush.msra.mxu0 %v98_v10  ;;  %v179_v38 = vld [vmem:[#allocation8 + $0x50] sm:$0xff]  ;;  %v178_v39 = vld [vmem:[#allocation8 + $0x48] sm:$0xff]  ;;  %v177_v40 = vld [vmem:[#allocation8 + $0x40] sm:$0xff] }
  0x21   :  { %155 = vmatpush.msra.mxu1 %v138_v15  ;;  %190 = vmatpush.msra.mxu2 %v183_v34  ;;  %v176_v41 = vld [vmem:[#allocation8 + $0x38] sm:$0xff]  ;;  %v175_v42 = vld [vmem:[#allocation8 + $0x30] sm:$0xff]  ;;  %v174_v43 = vld [vmem:[#allocation8 + $0x28] sm:$0xff] }
  0x22   :  { %116 = vmatpush.msra.mxu0 %v97_v12  ;;  %v173_v44 = vld [vmem:[#allocation8 + $0x20] sm:$0xff]  ;;  %v172_v45 = vld [vmem:[#allocation8 + $0x18] sm:$0xff]  ;;  %v171_v46 = vld [vmem:[#allocation8 + $0x10] sm:$0xff] }
  0x23   :  { %156 = vmatpush.msra.mxu1 %v137_v17  ;;  %191 = vmatpush.msra.mxu2 %v182_v35  ;;  %v236_v47 = vld [vmem:[%s440_s2] ss:$0 sm:$0xff]  ;;  %v170_v50 = vld [vmem:[#allocation8 + $0x8] sm:$0xff]  ;;  %v169_v51 = vld [vmem:[#allocation8] sm:$0xff]  ;;  %s373_s2 = smov [#allocation10]  }
  0x24   :  { %117 = vmatpush.msra.mxu0 %v96_v14  ;;  %v237_v52 = vld [vmem:[%s442_s4] ss:$0 sm:$0xff]  ;;  %s215_s25 = sshll.u32 %s373_s2, 4  ;;  %s216_s25 = int_to_ptr.vmem [resolvable:$true] %s215_s25 }
  0x25   :  { %157 = vmatpush.msra.mxu1 %v136_v19  ;;  %192 = vmatpush.msra.mxu2 %v181_v36  ;;  %v238_v55 = vld [vmem:[%s444_s6] ss:$0 sm:$0xff] }
  0x26   :  { %118 = vmatpush.msra.mxu0 %v95_v16 }
  0x27   :  { %158 = vmatpush.msra.mxu1 %v135_v21  ;;  %193 = vmatpush.msra.mxu2 %v180_v37 }
  0x28   :  { %119 = vmatpush.msra.mxu0 %v94_v18 }
  0x29   :  { %159 = vmatpush.msra.mxu1 %v134_v23  ;;  %194 = vmatpush.msra.mxu2 %v179_v38 }
  0x2a   :  { %120 = vmatpush.msra.mxu0 %v93_v20 }
  0x2b   :  { %160 = vmatpush.msra.mxu1 %v133_v25  ;;  %195 = vmatpush.msra.mxu2 %v178_v39 }
  0x2c   :  { %121 = vmatpush.msra.mxu0 %v92_v22 }
  0x2d   :  { %161 = vmatpush.msra.mxu1 %v132_v27  ;;  %196 = vmatpush.msra.mxu2 %v177_v40 }
  0x2e   :  { %122 = vmatpush.msra.mxu0 %v91_v24 }
  0x2f   :  { %162 = vmatpush.msra.mxu1 %v131_v30  ;;  %197 = vmatpush.msra.mxu2 %v176_v41 }
  0x30   :  { %123 = vmatpush.msra.mxu0 %v90_v26 }
  0x31   :  { %163 = vmatpush.msra.mxu1 %v130_v31  ;;  %198 = vmatpush.msra.mxu2 %v175_v42 }
  0x32   :  { %124 = vmatpush.msra.mxu0 %v89_v28 }
  0x33   :  { %125 = vmatmul.f32.vlgmr.msra.gmra.mxu0 %v88_v29  ;;  %164 = vmatpush.msra.mxu1 %v129_v32 }
  0x34   :  { %199 = vmatpush.msra.mxu2 %v174_v43 }
  0x36   :  { %200 = vmatpush.msra.mxu2 %v173_v44 }
  0x38   :  { %201 = vmatpush.msra.mxu2 %v172_v45 }
  0x3a   :  { %202 = vmatpush.msra.mxu2 %v171_v46 }
  0x3c   :  { %203 = vmatpush.msra.mxu2 %v170_v50 }
  0x3e   :  { %204 = vmatpush.msra.mxu2 %v169_v51 }
  0xb0   :  { %v126_v48 = vpop.f32.mrf.mxu0 }
  0xb1   :  { %v127_v49 = vadd.f32 %v236_v47, %v126_v48 }
  0xb3   :  { %165 = vmatmul.f32.vlgmr.msra.gmra.mxu1 %v127_v49 }
 0x130   :  { %v166_v53 = vpop.f32.mrf.mxu1 }
 0x131   :  { %v167_v54 = vadd.f32 %v237_v52, %v166_v53 }
 0x133   :  { %205 = vmatmul.f32.vlgmr.msra.gmra.mxu2 %v167_v54 }
 0x1b6   :  { %v206_v56 = vpop.f32.mrf.mxu2 }
 0x1b7   :  { %v207_v57 = vadd.f32 %v238_v55, %v206_v56 }
 0x1b9   :  { %209 = vst [vmem:[#allocation10] sm:$0xff] %v207_v57 }
 0x1ba   :  { %220 = dma.vmem_to_hbm [thread:$0]  %s216_s25, 128, %s218_s28, [#allocation4]  }
 0x1bb   :  { %365 = dma.done.wait [#allocation4], 128  }
 0x1bc   :  { %366 = vsyncadd [#allocation4], 4294967168 }
 0x1bd   :  { %225 = vsyncpa [#allocation3], 1 }
 0x1be   :  { %226 = vsyncpa [#allocation6], 1 }
 0x1bf   :  { %227 = vsyncpa [#allocation9], 1 }
 0x1c0   :  { %228 = vsyncpa [#allocation4], 1 }

</bundles_post_ra>
